<compile_context>
chip_gen: v7x
topology: tpu7x:2x2x1
jax: 0.10.0
libtpu: 0.0.40
codegen_flags: <defaults>
</compile_context>

<pallas_src>
import jax
import jax.numpy as jnp
from jax.experimental import pallas as pl
from jax.experimental.pallas import tpu as pltpu


def pinyin_lut_kernel(ids_ref, lut_ref, o_ref):
    """Fused embedding-lookup + Conv1d(k=2, stride=1, pad=0) + max-pool-over-time.

    ids_ref : (tn, locs) int32   pinyin char ids for this token tile
    lut_ref : (V_pad, 2*O)       folded table [emb@W0^T | emb@W1^T + b] (bf16)
    o_ref   : (tn, O) f32        max-pooled conv output
    """
    tn, locs = ids_ref.shape
    V = lut_ref.shape[0]
    O = o_ref.shape[-1]
    lut = lut_ref[...]

    # Hoisted once; reused by every position's one-hot compare.
    iota_v = jax.lax.broadcasted_iota(jnp.int32, (tn, V), 1)

    def taps(t):
        # One-hot row-select on the MXU: exact (0/1 weights), f32 accumulation.
        onehot = (ids_ref[:, t:t + 1] == iota_v).astype(lut.dtype)      # (tn, V)
        return jnp.dot(onehot, lut, preferred_element_type=jnp.float32)  # (tn, 2*O)

    y = taps(0)
    tap0_prev = y[:, :O]                  # (emb @ W0^T)[ids[:, 0]]
    acc = None
    for t in range(1, locs):              # locs is small & static -> unrolled
        y = taps(t)
        cur = tap0_prev + y[:, O:]        # conv output at temporal position t-1 (+ bias)
        acc = cur if acc is None else jnp.maximum(acc, cur)
        tap0_prev = y[:, :O]

    o_ref[...] = acc.astype(o_ref.dtype)


def _build_lut(emb_table, conv_w, conv_b, lut_dtype):
    """lut[v] = [ emb[v] @ W0^T , emb[v] @ W1^T + b ], V padded to a multiple of 128."""
    V, E = emb_table.shape
    O = conv_w.shape[0]
    w_packed = jnp.concatenate([conv_w[:, :, 0].T, conv_w[:, :, 1].T], axis=1)  # (E, 2*O)
    lut = jnp.dot(emb_table, w_packed,
                  precision=jax.lax.Precision.HIGHEST,
                  preferred_element_type=jnp.float32)                            # (V, 2*O)
    lut = lut.at[:, O:].add(conv_b.astype(jnp.float32))   # fold bias into tap-1 half
    V_pad = pl.cdiv(V, 128) * 128                         # lane-dense K for the one-hot matmul
    if V_pad != V:
        lut = jnp.pad(lut, ((0, V_pad - V), (0, 0)))      # zero rows, never selected (ids < V)
    return lut.astype(lut_dtype), V_pad


def pinyin_embedding_forward(pinyin_ids, emb_table, conv_w, conv_b, *, tn=1024,
                             lut_dtype=jnp.bfloat16):
    """pinyin_ids: (bs, sl, locs) int; emb_table: (V, E);
    conv_w: (O, E, 2); conv_b: (O,).  Returns (bs, sl, O) float32."""
    bs, sl, locs = pinyin_ids.shape
    V, E = emb_table.shape
    O = conv_w.shape[0]
    assert conv_w.shape == (O, E, 2)
    assert locs >= 2, "Conv1d(kernel_size=2) requires pinyin_locs >= 2"

    N = bs * sl
    # Token tile: multiple of 8 sublanes, clamped to the token count; shrink so
    # the grid keeps >= MIN_STEPS steps (v7x 2-TC sharding + pipeline overlap)
    # without going below 128-token tiles.
    MIN_STEPS = 8
    tn = max(8, min(int(tn), pl.cdiv(N, 8) * 8))
    while pl.cdiv(N, tn) < MIN_STEPS and tn > 128:
        tn = max(8, pl.cdiv(tn // 2, 8) * 8)
    n_pad = pl.cdiv(N, tn) * tn

    ids = pinyin_ids.reshape(N, locs).astype(jnp.int32)
    if n_pad != N:
        ids = jnp.pad(ids, ((0, n_pad - N), (0, 0)))   # pad tokens -> rows discarded below

    lut, V_pad = _build_lut(emb_table, conv_w, conv_b, lut_dtype)

    out = pl.pallas_call(
        pinyin_lut_kernel,
        out_shape=jax.ShapeDtypeStruct((n_pad, O), jnp.float32),
        grid=(n_pad // tn,),
        in_specs=[
            pl.BlockSpec((tn, locs), lambda i: (i, 0)),       # streamed ids tile
            pl.BlockSpec((V_pad, 2 * O), lambda i: (0, 0)),   # resident folded LUT
        ],
        out_specs=pl.BlockSpec((tn, O), lambda i: (i, 0)),
        compiler_params=pltpu.CompilerParams(
            # "parallel" shards the token axis across TensorCores on multi-TC chips.
            dimension_semantics=("parallel",),
            vmem_limit_bytes=32 * 1024 * 1024,   # explicit headroom for large tiles (v5e default is 16 MiB)
        ),
    )(ids, lut)

    return out[:N].reshape(bs, sl, O)


def pinyin_embedding_reference(pinyin_ids, emb_table, conv_w, conv_b):
    """Pure-JAX f32 reference mirroring the PyTorch forward exactly."""
    bs, sl, locs = pinyin_ids.shape
    E = emb_table.shape[1]
    O = conv_w.shape[0]
    embed = jnp.take(emb_table, pinyin_ids.reshape(-1), axis=0).reshape(bs * sl, locs, E)
    w0 = conv_w[:, :, 0]
    w1 = conv_w[:, :, 1]
    y = (jnp.einsum('nle,oe->nlo', embed[:, :-1, :], w0,
                    precision=jax.lax.Precision.HIGHEST)
         + jnp.einsum('nle,oe->nlo', embed[:, 1:, :], w1,
                      precision=jax.lax.Precision.HIGHEST)
         + conv_b[None, None, :])
    return jnp.max(y, axis=1).reshape(bs, sl, O)


def lut_reference(pinyin_ids, emb_table, conv_w, conv_b, lut_dtype=jnp.bfloat16):
    """Reference that replays the kernel's quantized-LUT math exactly (host gather)."""
    bs, sl, locs = pinyin_ids.shape
    O = conv_w.shape[0]
    lut, _ = _build_lut(emb_table, conv_w, conv_b, lut_dtype)
    lut = lut.astype(jnp.float32)
    rows = jnp.take(lut, pinyin_ids.reshape(-1), axis=0).reshape(bs * sl, locs, 2 * O)
    y = rows[:, :-1, :O] + rows[:, 1:, O:]
    return jnp.max(y, axis=1).reshape(bs, sl, O)


if __name__ == "__main__":
    # Small synthetic configuration.  E and O are 128 as in the real ChineseBERT
    # config (keeps all operands lane-dense); vocab is synthetic.
    vocab_size = 32          # stands in for len(pinyin_dict['idx2char'])
    embedding_size = 128     # E
    pinyin_out_dim = 128     # O
    bs, sentence_length, pinyin_locs = 2, 8, 8

    key = jax.random.PRNGKey(0)
    k_ids, k_emb, k_w, k_b = jax.random.split(key, 4)

    pinyin_ids = jax.random.randint(
        k_ids, (bs, sentence_length, pinyin_locs), 0, vocab_size, dtype=jnp.int32)
    emb_table = jax.random.normal(k_emb, (vocab_size, embedding_size), dtype=jnp.float32)
    conv_w = (jax.random.normal(k_w, (pinyin_out_dim, embedding_size, 2), dtype=jnp.float32)
              * 0.1)
    conv_b = jax.random.normal(k_b, (pinyin_out_dim,), dtype=jnp.float32) * 0.1

    out = pinyin_embedding_forward(pinyin_ids, emb_table, conv_w, conv_b)
    out = jax.block_until_ready(out)
    assert out.shape == (bs, sentence_length, pinyin_out_dim)

    # Tight check: reference that performs the identical bf16-LUT select + f32 add/max.
    ref_lut = lut_reference(pinyin_ids, emb_table, conv_w, conv_b)
    assert jnp.allclose(out, ref_lut, atol=1e-5, rtol=1e-5), "mismatch vs LUT-matched reference"

    # Check vs the pure-f32 PyTorch-equivalent forward (covers bf16 LUT quantization).
    ref_f32 = pinyin_embedding_reference(pinyin_ids, emb_table, conv_w, conv_b)
    assert jnp.allclose(out, ref_f32, atol=3e-2, rtol=3e-2), "mismatch vs f32 reference"

    print("KERNEL_OK")
</pallas_src>

<mosaic_0001>
module attributes {stable_mosaic.version = 11 : i64} {
  func.func @pinyin_lut_kernel(%arg0: i32, %arg1: memref<16x8xi32, #tpu.memory_space<vmem>>, %arg2: memref<128x256xbf16, #tpu.memory_space<vmem>>, %arg3: memref<16x128xf32, #tpu.memory_space<vmem>>) attributes {dimension_semantics = [#tpu.dimension_semantics<parallel>], iteration_bounds = array<i64: 1>, scalar_prefetch = 0 : i64, scratch_operands = 0 : i64, tpu.core_type = #tpu.core_type<tc>, window_params = [{transform_indices = @transform_0, window_bounds = array<i64: 16, 8>}, {pipeline_mode = #tpu.pipeline_mode<synchronous>, transform_indices = @transform_1, window_bounds = array<i64: 128, 256>}, {transform_indices = @transform_2, window_bounds = array<i64: 16, 128>}]} {
    %c0 = arith.constant 0 : index
    %c0_0 = arith.constant 0 : index
    %0 = vector.load %arg2[%c0, %c0_0] : memref<128x256xbf16, #tpu.memory_space<vmem>>, vector<128x256xbf16>
    %1 = tpu.iota {dimensions = array<i32: 1>} : vector<16x128xi32>
    %c0_1 = arith.constant 0 : index
    %c0_2 = arith.constant 0 : index
    %2 = vector.load %arg1[%c0_1, %c0_2] : memref<16x8xi32, #tpu.memory_space<vmem>>, vector<16x1xi32>
    %3 = vector.broadcast %2 : vector<16x1xi32> to vector<16x128xi32>
    %4 = arith.cmpi eq, %3, %1 : vector<16x128xi32>
    %5 = arith.extui %4 : vector<16x128xi1> to vector<16x128xi32>
    %6 = arith.sitofp %5 : vector<16x128xi32> to vector<16x128xf32>
    %7 = arith.truncf %6 : vector<16x128xf32> to vector<16x128xbf16>
    %cst = arith.constant dense<0.000000e+00> : vector<16x256xf32>
    %8 = tpu.matmul %7, %0, %cst {dimension_numbers = #tpu.dot_dimension_numbers<[1], [0], [0], [1], [0, 0, 1, 1], [], []>} : vector<16x128xbf16>, vector<128x256xbf16>, vector<16x256xf32> -> vector<16x256xf32>
    %9 = vector.extract_strided_slice %8 {offsets = [0, 0], sizes = [16, 128], strides = [1, 1]} : vector<16x256xf32> to vector<16x128xf32>
    %c0_3 = arith.constant 0 : index
    %c1 = arith.constant 1 : index
    %10 = vector.load %arg1[%c0_3, %c1] : memref<16x8xi32, #tpu.memory_space<vmem>>, vector<16x1xi32>
    %11 = vector.broadcast %10 : vector<16x1xi32> to vector<16x128xi32>
    %12 = arith.cmpi eq, %11, %1 : vector<16x128xi32>
    %13 = arith.extui %12 : vector<16x128xi1> to vector<16x128xi32>
    %14 = arith.sitofp %13 : vector<16x128xi32> to vector<16x128xf32>
    %15 = arith.truncf %14 : vector<16x128xf32> to vector<16x128xbf16>
    %cst_4 = arith.constant dense<0.000000e+00> : vector<16x256xf32>
    %16 = tpu.matmul %15, %0, %cst_4 {dimension_numbers = #tpu.dot_dimension_numbers<[1], [0], [0], [1], [0, 0, 1, 1], [], []>} : vector<16x128xbf16>, vector<128x256xbf16>, vector<16x256xf32> -> vector<16x256xf32>
    %17 = vector.extract_strided_slice %16 {offsets = [0, 128], sizes = [16, 128], strides = [1, 1]} : vector<16x256xf32> to vector<16x128xf32>
    %18 = arith.addf %9, %17 : vector<16x128xf32>
    %19 = vector.extract_strided_slice %16 {offsets = [0, 0], sizes = [16, 128], strides = [1, 1]} : vector<16x256xf32> to vector<16x128xf32>
    %c0_5 = arith.constant 0 : index
    %c2 = arith.constant 2 : index
    %20 = vector.load %arg1[%c0_5, %c2] : memref<16x8xi32, #tpu.memory_space<vmem>>, vector<16x1xi32>
    %21 = vector.broadcast %20 : vector<16x1xi32> to vector<16x128xi32>
    %22 = arith.cmpi eq, %21, %1 : vector<16x128xi32>
    %23 = arith.extui %22 : vector<16x128xi1> to vector<16x128xi32>
    %24 = arith.sitofp %23 : vector<16x128xi32> to vector<16x128xf32>
    %25 = arith.truncf %24 : vector<16x128xf32> to vector<16x128xbf16>
    %cst_6 = arith.constant dense<0.000000e+00> : vector<16x256xf32>
    %26 = tpu.matmul %25, %0, %cst_6 {dimension_numbers = #tpu.dot_dimension_numbers<[1], [0], [0], [1], [0, 0, 1, 1], [], []>} : vector<16x128xbf16>, vector<128x256xbf16>, vector<16x256xf32> -> vector<16x256xf32>
    %27 = vector.extract_strided_slice %26 {offsets = [0, 128], sizes = [16, 128], strides = [1, 1]} : vector<16x256xf32> to vector<16x128xf32>
    %28 = arith.addf %19, %27 : vector<16x128xf32>
    %29 = arith.maximumf %18, %28 : vector<16x128xf32>
    %30 = vector.extract_strided_slice %26 {offsets = [0, 0], sizes = [16, 128], strides = [1, 1]} : vector<16x256xf32> to vector<16x128xf32>
    %c0_7 = arith.constant 0 : index
    %c3 = arith.constant 3 : index
    %31 = vector.load %arg1[%c0_7, %c3] : memref<16x8xi32, #tpu.memory_space<vmem>>, vector<16x1xi32>
    %32 = vector.broadcast %31 : vector<16x1xi32> to vector<16x128xi32>
    %33 = arith.cmpi eq, %32, %1 : vector<16x128xi32>
    %34 = arith.extui %33 : vector<16x128xi1> to vector<16x128xi32>
    %35 = arith.sitofp %34 : vector<16x128xi32> to vector<16x128xf32>
    %36 = arith.truncf %35 : vector<16x128xf32> to vector<16x128xbf16>
    %cst_8 = arith.constant dense<0.000000e+00> : vector<16x256xf32>
    %37 = tpu.matmul %36, %0, %cst_8 {dimension_numbers = #tpu.dot_dimension_numbers<[1], [0], [0], [1], [0, 0, 1, 1], [], []>} : vector<16x128xbf16>, vector<128x256xbf16>, vector<16x256xf32> -> vector<16x256xf32>
    %38 = vector.extract_strided_slice %37 {offsets = [0, 128], sizes = [16, 128], strides = [1, 1]} : vector<16x256xf32> to vector<16x128xf32>
    %39 = arith.addf %30, %38 : vector<16x128xf32>
    %40 = arith.maximumf %29, %39 : vector<16x128xf32>
    %41 = vector.extract_strided_slice %37 {offsets = [0, 0], sizes = [16, 128], strides = [1, 1]} : vector<16x256xf32> to vector<16x128xf32>
    %c0_9 = arith.constant 0 : index
    %c4 = arith.constant 4 : index
    %42 = vector.load %arg1[%c0_9, %c4] : memref<16x8xi32, #tpu.memory_space<vmem>>, vector<16x1xi32>
    %43 = vector.broadcast %42 : vector<16x1xi32> to vector<16x128xi32>
    %44 = arith.cmpi eq, %43, %1 : vector<16x128xi32>
    %45 = arith.extui %44 : vector<16x128xi1> to vector<16x128xi32>
    %46 = arith.sitofp %45 : vector<16x128xi32> to vector<16x128xf32>
    %47 = arith.truncf %46 : vector<16x128xf32> to vector<16x128xbf16>
    %cst_10 = arith.constant dense<0.000000e+00> : vector<16x256xf32>
    %48 = tpu.matmul %47, %0, %cst_10 {dimension_numbers = #tpu.dot_dimension_numbers<[1], [0], [0], [1], [0, 0, 1, 1], [], []>} : vector<16x128xbf16>, vector<128x256xbf16>, vector<16x256xf32> -> vector<16x256xf32>
    %49 = vector.extract_strided_slice %48 {offsets = [0, 128], sizes = [16, 128], strides = [1, 1]} : vector<16x256xf32> to vector<16x128xf32>
    %50 = arith.addf %41, %49 : vector<16x128xf32>
    %51 = arith.maximumf %40, %50 : vector<16x128xf32>
    %52 = vector.extract_strided_slice %48 {offsets = [0, 0], sizes = [16, 128], strides = [1, 1]} : vector<16x256xf32> to vector<16x128xf32>
    %c0_11 = arith.constant 0 : index
    %c5 = arith.constant 5 : index
    %53 = vector.load %arg1[%c0_11, %c5] : memref<16x8xi32, #tpu.memory_space<vmem>>, vector<16x1xi32>
    %54 = vector.broadcast %53 : vector<16x1xi32> to vector<16x128xi32>
    %55 = arith.cmpi eq, %54, %1 : vector<16x128xi32>
    %56 = arith.extui %55 : vector<16x128xi1> to vector<16x128xi32>
    %57 = arith.sitofp %56 : vector<16x128xi32> to vector<16x128xf32>
    %58 = arith.truncf %57 : vector<16x128xf32> to vector<16x128xbf16>
    %cst_12 = arith.constant dense<0.000000e+00> : vector<16x256xf32>
    %59 = tpu.matmul %58, %0, %cst_12 {dimension_numbers = #tpu.dot_dimension_numbers<[1], [0], [0], [1], [0, 0, 1, 1], [], []>} : vector<16x128xbf16>, vector<128x256xbf16>, vector<16x256xf32> -> vector<16x256xf32>
    %60 = vector.extract_strided_slice %59 {offsets = [0, 128], sizes = [16, 128], strides = [1, 1]} : vector<16x256xf32> to vector<16x128xf32>
    %61 = arith.addf %52, %60 : vector<16x128xf32>
    %62 = arith.maximumf %51, %61 : vector<16x128xf32>
    %63 = vector.extract_strided_slice %59 {offsets = [0, 0], sizes = [16, 128], strides = [1, 1]} : vector<16x256xf32> to vector<16x128xf32>
    %c0_13 = arith.constant 0 : index
    %c6 = arith.constant 6 : index
    %64 = vector.load %arg1[%c0_13, %c6] : memref<16x8xi32, #tpu.memory_space<vmem>>, vector<16x1xi32>
    %65 = vector.broadcast %64 : vector<16x1xi32> to vector<16x128xi32>
    %66 = arith.cmpi eq, %65, %1 : vector<16x128xi32>
    %67 = arith.extui %66 : vector<16x128xi1> to vector<16x128xi32>
    %68 = arith.sitofp %67 : vector<16x128xi32> to vector<16x128xf32>
    %69 = arith.truncf %68 : vector<16x128xf32> to vector<16x128xbf16>
    %cst_14 = arith.constant dense<0.000000e+00> : vector<16x256xf32>
    %70 = tpu.matmul %69, %0, %cst_14 {dimension_numbers = #tpu.dot_dimension_numbers<[1], [0], [0], [1], [0, 0, 1, 1], [], []>} : vector<16x128xbf16>, vector<128x256xbf16>, vector<16x256xf32> -> vector<16x256xf32>
    %71 = vector.extract_strided_slice %70 {offsets = [0, 128], sizes = [16, 128], strides = [1, 1]} : vector<16x256xf32> to vector<16x128xf32>
    %72 = arith.addf %63, %71 : vector<16x128xf32>
    %73 = arith.maximumf %62, %72 : vector<16x128xf32>
    %74 = vector.extract_strided_slice %70 {offsets = [0, 0], sizes = [16, 128], strides = [1, 1]} : vector<16x256xf32> to vector<16x128xf32>
    %c0_15 = arith.constant 0 : index
    %c7 = arith.constant 7 : index
    %75 = vector.load %arg1[%c0_15, %c7] : memref<16x8xi32, #tpu.memory_space<vmem>>, vector<16x1xi32>
    %76 = vector.broadcast %75 : vector<16x1xi32> to vector<16x128xi32>
    %77 = arith.cmpi eq, %76, %1 : vector<16x128xi32>
    %78 = arith.extui %77 : vector<16x128xi1> to vector<16x128xi32>
    %79 = arith.sitofp %78 : vector<16x128xi32> to vector<16x128xf32>
    %80 = arith.truncf %79 : vector<16x128xf32> to vector<16x128xbf16>
    %cst_16 = arith.constant dense<0.000000e+00> : vector<16x256xf32>
    %81 = tpu.matmul %80, %0, %cst_16 {dimension_numbers = #tpu.dot_dimension_numbers<[1], [0], [0], [1], [0, 0, 1, 1], [], []>} : vector<16x128xbf16>, vector<128x256xbf16>, vector<16x256xf32> -> vector<16x256xf32>
    %82 = vector.extract_strided_slice %81 {offsets = [0, 128], sizes = [16, 128], strides = [1, 1]} : vector<16x256xf32> to vector<16x128xf32>
    %83 = arith.addf %74, %82 : vector<16x128xf32>
    %84 = arith.maximumf %73, %83 : vector<16x128xf32>
    %c0_17 = arith.constant 0 : index
    %c0_18 = arith.constant 0 : index
    %85 = vector.load %arg3[%c0_17, %c0_18] : memref<16x128xf32, #tpu.memory_space<vmem>>, vector<16x128xf32>
    tpu.vector_store %arg3[%c0_17, %c0_18], %84 {strides = array<i32>} : memref<16x128xf32, #tpu.memory_space<vmem>>, vector<16x128xf32>,
    return
  }
  func.func @transform_0(%arg0: i32) -> (i32, i32) {
    %c0_i32 = arith.constant 0 : i32
    %c0_i32_0 = arith.constant 0 : i32
    return %arg0, %c0_i32 : i32, i32
  }
  func.func @transform_1(%arg0: i32) -> (i32, i32) {
    %c0_i32 = arith.constant 0 : i32
    %c0_i32_0 = arith.constant 0 : i32
    %c0_i32_1 = arith.constant 0 : i32
    return %c0_i32, %c0_i32_0 : i32, i32
  }
  func.func @transform_2(%arg0: i32) -> (i32, i32) {
    %c0_i32 = arith.constant 0 : i32
    %c0_i32_0 = arith.constant 0 : i32
    return %arg0, %c0_i32 : i32, i32
  }
}

</mosaic_0001>

<bundles_post_ra>
// kernel: tpu_custom_call.1
= control target key start
LH: loop header
LB: loop body
LE: loop exit
PB: predicated region body
PF: predicated region fallthrough
CT: control target
= control target key end

     0   :  { %7 = vsyncpa [#allocation3], 0  ;;  %s1041_s0 = inlined_call_operand.vmem [shape: s32[16,8], index: 0, kind: input, shape index: {}]   ;;  %s1042_s1 = inlined_call_operand.hbm [shape: bf16[128,256], index: 1, kind: input, shape index: {}]   ;;  %s1043_s2 = inlined_call_operand.hbm [shape: f32[16,128], index: 2, kind: output, shape index: {}]  }
   0x1   :  { %8 = vsyncpa [#allocation4], 0  ;;  %s762_s9 = smov [#allocation2]   ;;  %s714_s13 = scalar_lea.hbm %s1042_s1, 2048 }
   0x2   :  { %s16_s10 = sshll.u32 %s762_s9, 4  ;;  %p715_p0 = scmp.ne.s32.totalorder %s1042_s1, %s714_s13  ;;  %s17_s10 = int_to_ptr.vmem [resolvable:$true] %s16_s10 }
   0x3   :  { %p718_p1 = scmp.lt.u32.totalorder %s714_s13, %s1042_s1 }
   0x5   :  { %p720_p2 = pnand %p718_p1, %p715_p0 }
   0x7   :  { %723 = shalt.err (!%p720_p2)
}
   0x8   :  { %s724_s18 = scalar_lea.vmem %s17_s10, 2048  ;;  %p729_p4 = scmp.lt.s32.totalorder %s17_s10, %s17_s10 }
   0x9   :  { %p725_p3 = scmp.ne.s32.totalorder %s17_s10, %s724_s18  ;;  %p730_p5 = scmp.lt.s32.totalorder %s724_s18, %s724_s18 }
   0xb   :  { %p731_p6 = por %p730_p5, %p729_p4 }
   0xd   :  { %p732_p7 = pnand %p731_p6, %p725_p3 }
   0xf   :  { %735 = shalt.err (!%p732_p7)
}
  0x10   :  { %s763_s19 = smov 128   ;;  %s764_s20 = smov 8  }
  0x11   :  { %22 = dma.hbm_to_vmem [thread:$0]  %s1042_s1, 2048, %s17_s10, [#allocation3], %s763_s19, %s763_s19, %s764_s20  }
  0x12   :  { %758 = dma.done.wait [#allocation3], 2048  }
  0x13   :  { %759 = vsyncadd [#allocation3], 4294965248  ;;  %v765_v0 = vmov 1   ;;  %v766_v1 = vmov 0   ;;  %v811_v2 = vld [vmem:[%s1041_s0] sm:$0xff]  ;;  %v816_v3 = vld [vmem:[%s1041_s0 + $0x8] sm:$0xff]  ;;  %v43_v26 = vlaneseq }
  0x14   :  { %678 = vset.pattern.permute.xlu1 %v765_v0  ;;  %677 = vset.pattern.permute.xlu0 %v766_v1  ;;  %v820_v4 = vld [vmem:[#allocation2 + $0x4] ss:$8 sps:$4 sm:$0xff]   ;;  %v822_v5 = vld [vmem:[#allocation2] ss:$8 sps:$4 sm:$0xff]   ;;  %v824_v6 = vld [vmem:[#allocation2 + $0x14] ss:$8 sps:$4 sm:$0xff]  }
  0x15   :  { %172 = vmatprep.mubr.bf16.mxu0 %v766_v1  ;;  %226 = vmatprep.mubr.bf16.mxu1 %v766_v1  ;;  %v830_v7 = vld [vmem:[#allocation2 + $0x10] ss:$8 sps:$4 sm:$0xff]   ;;  %v836_v8 = vld [vmem:[#allocation2 + $0x24] ss:$8 sps:$4 sm:$0xff]   ;;  %v840_v9 = vld [vmem:[#allocation2 + $0x20] ss:$8 sps:$4 sm:$0xff]  }
  0x16   :  { %182 = vperm.xlu1 %678, %v811_v2   ;;  %48 = vperm.xlu0 %677, %v811_v2   ;;  %v767_v10 = vmov 2   ;;  %v842_v11 = vld [vmem:[#allocation2 + $0x34] ss:$8 sps:$4 sm:$0xff]   ;;  %v850_v12 = vld [vmem:[#allocation2 + $0x30] ss:$8 sps:$4 sm:$0xff]   ;;  %v768_v14 = vmov 3  }
  0x17   :  { %140 = vmatprep.subr.bf16.mxu0 %v820_v4  ;;  %194 = vmatprep.subr.bf16.mxu1 %v820_v4  ;;  %v854_v13 = vld [vmem:[#allocation2 + $0x44] ss:$8 sps:$4 sm:$0xff]   ;;  %v862_v15 = vld [vmem:[#allocation2 + $0x40] ss:$8 sps:$4 sm:$0xff]   ;;  %v864_v16 = vld [vmem:[#allocation2 + $0x54] ss:$8 sps:$4 sm:$0xff]  }
  0x18   :  { %141 = vmatpush1.bf16.msra.mxu0 %v822_v5  ;;  %195 = vmatpush1.bf16.msra.mxu1 %v822_v5  ;;  %v769_v17 = vmov 4   ;;  %v770_v18 = vmov 5   ;;  %v870_v19 = vld [vmem:[#allocation2 + $0x50] ss:$8 sps:$4 sm:$0xff]   ;;  %v874_v20 = vld [vmem:[#allocation2 + $0x64] ss:$8 sps:$4 sm:$0xff]  }
  0x19   :  { %142 = vmatprep.subr.bf16.mxu0 %v824_v6  ;;  %196 = vmatprep.subr.bf16.mxu1 %v824_v6  ;;  %v771_v21 = vmov 6   ;;  %v879_v22 = vld [vmem:[#allocation2 + $0x60] ss:$8 sps:$4 sm:$0xff]   ;;  %v883_v23 = vld [vmem:[#allocation2 + $0x74] ss:$8 sps:$4 sm:$0xff]   ;;  %v772_v25 = vmov 7  }
  0x1a   :  { %185 = vperm.xlu1 %678, %v816_v3   ;;  %51 = vperm.xlu0 %677, %v816_v3   ;;  %v888_v24 = vld [vmem:[#allocation2 + $0x70] ss:$8 sps:$4 sm:$0xff]   ;;  %v900_v29 = vand.u32 127, %v43_v26  ;;  %v773_v32 = vmov 1.0|1.0   ;;  %s774_s0 = smov [#allocation5]  }
  0x1b   :  { %s604_s1 = sshll.u32 %s774_s0, 4  ;;  %s605_s1 = int_to_ptr.vmem [resolvable:$true] %s604_s1 }
  0x1c   :  { %143 = vmatpush1.bf16.msra.mxu0 %v830_v7  ;;  %197 = vmatpush1.bf16.msra.mxu1 %v830_v7  ;;  %s736_s27 = scalar_lea.vmem %s605_s1, 256  ;;  %p741_p9 = scmp.lt.s32.totalorder %s605_s1, %s605_s1 }
  0x1d   :  { %144 = vmatprep.subr.bf16.mxu0 %v836_v8  ;;  %198 = vmatprep.subr.bf16.mxu1 %v836_v8  ;;  %p737_p8 = scmp.ne.s32.totalorder %s605_s1, %s736_s27  ;;  %p742_p10 = scmp.lt.s32.totalorder %s736_s27, %s736_s27 }
  0x1e   :  { %680 = vset.pattern.permute.xlu1 %v767_v10  ;;  %679 = vset.pattern.permute.xlu0 %v767_v10 }
  0x1f   :  { %243 = vperm.xlu1 %680, %v816_v3   ;;  %240 = vperm.xlu0 %679, %v811_v2   ;;  %p743_p11 = por %p742_p10, %p741_p9 }
  0x20   :  { %145 = vmatpush1.bf16.msra.mxu0 %v840_v9  ;;  %199 = vmatpush1.bf16.msra.mxu1 %v840_v9 }
  0x21   :  { %146 = vmatprep.subr.bf16.mxu0 %v842_v11  ;;  %200 = vmatprep.subr.bf16.mxu1 %v842_v11  ;;  %p744_p12 = pnand %p743_p11, %p737_p8 }
  0x23   :  { %681 = vset.pattern.permute.xlu1 %v768_v14  ;;  %682 = vset.pattern.permute.xlu0 %v768_v14 }
  0x24   :  { %300 = vperm.xlu1 %681, %v811_v2   ;;  %303 = vperm.xlu0 %682, %v816_v3  }
  0x25   :  { %147 = vmatpush1.bf16.msra.mxu0 %v850_v12  ;;  %201 = vmatpush1.bf16.msra.mxu1 %v850_v12 }
  0x26   :  { %148 = vmatprep.subr.bf16.mxu0 %v854_v13  ;;  %202 = vmatprep.subr.bf16.mxu1 %v854_v13 }
  0x28   :  { %683 = vset.pattern.permute.xlu1 %v769_v17  ;;  %684 = vset.pattern.permute.xlu0 %v770_v18 }
  0x29   :  { %360 = vperm.xlu1 %683, %v811_v2   ;;  %420 = vperm.xlu0 %684, %v811_v2  }
  0x2a   :  { %149 = vmatpush1.bf16.msra.mxu0 %v862_v15  ;;  %203 = vmatpush1.bf16.msra.mxu1 %v862_v15 }
  0x2b   :  { %150 = vmatprep.subr.bf16.mxu0 %v864_v16  ;;  %204 = vmatprep.subr.bf16.mxu1 %v864_v16 }
  0x2d   :  { %363 = vperm.xlu1 %683, %v816_v3   ;;  %687 = vset.pattern.permute.xlu0 %v771_v21 }
  0x2e   :  { %483 = vperm.xlu0 %687, %v816_v3   ;;  %151 = vmatpush1.bf16.msra.mxu0 %v870_v19 }
  0x2f   :  { %205 = vmatpush1.bf16.msra.mxu1 %v870_v19  ;;  %152 = vmatprep.subr.bf16.mxu0 %v874_v20 }
  0x30   :  { %206 = vmatprep.subr.bf16.mxu1 %v874_v20 }
  0x31   :  { %685 = vset.pattern.permute.xlu1 %v770_v18 }
  0x32   :  { %423 = vperm.xlu1 %685, %v816_v3   ;;  %153 = vmatpush1.bf16.msra.mxu0 %v879_v22 }
  0x33   :  { %207 = vmatpush1.bf16.msra.mxu1 %v879_v22  ;;  %154 = vmatprep.subr.bf16.mxu0 %v883_v23 }
  0x34   :  { %208 = vmatprep.subr.bf16.mxu1 %v883_v23  ;;  %689 = vset.pattern.permute.xlu0 %v772_v25 }
  0x36   :  { %686 = vset.pattern.permute.xlu1 %v771_v21  ;;  %155 = vmatpush1.bf16.msra.mxu0 %v888_v24 }
  0x37   :  { %480 = vperm.xlu1 %686, %v811_v2   ;;  %209 = vmatpush1.bf16.msra.mxu1 %v888_v24 }
  0x38   :  { %252 = vmatprep.subr.bf16.mxu0 %v820_v4  ;;  %312 = vmatprep.subr.bf16.mxu1 %v820_v4 }
  0x3b   :  { %688 = vset.pattern.permute.xlu1 %v772_v25 }
  0x3c   :  { %540 = vperm.xlu1 %688, %v811_v2  }
  0x40   :  { %543 = vperm.xlu1 %688, %v816_v3  }
  0x95   :  { %v183_v27 = vpop.permute.xlu1 %182  ;;  %v49_v28 = vpop.permute.xlu0 %48 }
  0x96   :  { %vm187_vm0 = vcmp.eq.s32.totalorder %v183_v27, %v900_v29  ;;  %vm53_vm3 = vcmp.eq.s32.totalorder %v49_v28, %v900_v29 }
  0x99   :  { %v186_v30 = vpop.permute.xlu1 %185  ;;  %v52_v31 = vpop.permute.xlu0 %51 }
  0x9a   :  { %vm188_vm1 = vcmp.eq.s32.totalorder %v186_v30, %v900_v29  ;;  %vm54_vm2 = vcmp.eq.s32.totalorder %v52_v31, %v900_v29 }
  0x9b   :  { %vm638_vm4 = vmpackc.low %vm188_vm1, %vm187_vm0 }
  0x9c   :  { %vm634_vm5 = vmpackc.low %vm54_vm2, %vm53_vm3  ;;  %639 = vmatmul.mubr.msk.bf16.vlgmr.msra.gmra.mrb[0].mxu1 %vm638_vm4, %v773_v32 }
  0x9d   :  { %635 = vmatmul.mubr.msk.bf16.vlgmr.msra.gmra.mrb[0].mxu0 %vm634_vm5, %v773_v32  ;;  %313 = vmatpush1.bf16.msra.mxu1 %v822_v5 }
  0x9e   :  { %253 = vmatpush1.bf16.msra.mxu0 %v822_v5  ;;  %314 = vmatprep.subr.bf16.mxu1 %v824_v6  ;;  %v244_v33 = vpop.permute.xlu1 %243  ;;  %v241_v34 = vpop.permute.xlu0 %240 }
  0x9f   :  { %254 = vmatprep.subr.bf16.mxu0 %v824_v6  ;;  %284 = vmatprep.mubr.bf16.mxu0 %v766_v1  ;;  %vm246_vm8 = vcmp.eq.s32.totalorder %v244_v33, %v900_v29  ;;  %vm245_vm9 = vcmp.eq.s32.totalorder %v241_v34, %v900_v29 }
  0xa0   :  { %344 = vmatprep.mubr.bf16.mxu1 %v766_v1  ;;  %vm642_vm11 = vmpackc.low %vm246_vm8, %vm245_vm9 }
  0xa1   :  { %315 = vmatpush1.bf16.msra.mxu1 %v830_v7 }
  0xa2   :  { %255 = vmatpush1.bf16.msra.mxu0 %v830_v7  ;;  %316 = vmatprep.subr.bf16.mxu1 %v836_v8 }
  0xa3   :  { %256 = vmatprep.subr.bf16.mxu0 %v836_v8  ;;  %v301_v35 = vpop.permute.xlu1 %300  ;;  %v304_v36 = vpop.permute.xlu0 %303 }
  0xa4   :  { %vm305_vm6 = vcmp.eq.s32.totalorder %v301_v35, %v900_v29  ;;  %vm306_vm7 = vcmp.eq.s32.totalorder %v304_v36, %v900_v29 }
  0xa5   :  { %317 = vmatpush1.bf16.msra.mxu1 %v840_v9  ;;  %vm646_vm10 = vmpackc.low %vm306_vm7, %vm305_vm6 }
  0xa6   :  { %257 = vmatpush1.bf16.msra.mxu0 %v840_v9  ;;  %318 = vmatprep.subr.bf16.mxu1 %v842_v11 }
  0xa7   :  { %258 = vmatprep.subr.bf16.mxu0 %v842_v11 }
  0xa8   :  { %v361_v37 = vpop.permute.xlu1 %360  ;;  %v421_v40 = vpop.permute.xlu0 %420 }
  0xa9   :  { %319 = vmatpush1.bf16.msra.mxu1 %v850_v12  ;;  %vm425_vm13 = vcmp.eq.s32.totalorder %v421_v40, %v900_v29  ;;  %vm365_vm14 = vcmp.eq.s32.totalorder %v361_v37, %v900_v29 }
  0xaa   :  { %259 = vmatpush1.bf16.msra.mxu0 %v850_v12  ;;  %320 = vmatprep.subr.bf16.mxu1 %v854_v13 }
  0xab   :  { %260 = vmatprep.subr.bf16.mxu0 %v854_v13 }
  0xac   :  { %v364_v38 = vpop.permute.xlu1 %363 }
  0xad   :  { %321 = vmatpush1.bf16.msra.mxu1 %v862_v15  ;;  %vm366_vm15 = vcmp.eq.s32.totalorder %v364_v38, %v900_v29  ;;  %v484_v44 = vpop.permute.xlu0 %483 }
  0xae   :  { %261 = vmatpush1.bf16.msra.mxu0 %v862_v15  ;;  %322 = vmatprep.subr.bf16.mxu1 %v864_v16  ;;  %vm650_vm1 = vmpackc.low %vm366_vm15, %vm365_vm14  ;;  %vm486_vm5 = vcmp.eq.s32.totalorder %v484_v44, %v900_v29 }
  0xaf   :  { %262 = vmatprep.subr.bf16.mxu0 %v864_v16 }
  0xb1   :  { %323 = vmatpush1.bf16.msra.mxu1 %v870_v19  ;;  %v424_v39 = vpop.permute.xlu1 %423 }
  0xb2   :  { %263 = vmatpush1.bf16.msra.mxu0 %v870_v19  ;;  %324 = vmatprep.subr.bf16.mxu1 %v874_v20  ;;  %vm426_vm12 = vcmp.eq.s32.totalorder %v424_v39, %v900_v29 }
  0xb3   :  { %264 = vmatprep.subr.bf16.mxu0 %v874_v20  ;;  %vm654_vm0 = vmpackc.low %vm426_vm12, %vm425_vm13 }
  0xb5   :  { %325 = vmatpush1.bf16.msra.mxu1 %v879_v22 }
  0xb6   :  { %265 = vmatpush1.bf16.msra.mxu0 %v879_v22  ;;  %326 = vmatprep.subr.bf16.mxu1 %v883_v23  ;;  %v481_v41 = vpop.permute.xlu1 %480 }
  0xb7   :  { %266 = vmatprep.subr.bf16.mxu0 %v883_v23  ;;  %vm485_vm4 = vcmp.eq.s32.totalorder %v481_v41, %v900_v29 }
  0xb8   :  { %vm658_vm7 = vmpackc.low %vm486_vm5, %vm485_vm4 }
  0xb9   :  { %327 = vmatpush1.bf16.msra.mxu1 %v888_v24 }
  0xba   :  { %267 = vmatpush1.bf16.msra.mxu0 %v888_v24  ;;  %432 = vmatprep.subr.bf16.mxu1 %v820_v4 }
  0xbb   :  { %372 = vmatprep.subr.bf16.mxu0 %v820_v4  ;;  %v541_v42 = vpop.permute.xlu1 %540 }
  0xbc   :  { %647 = vmatmul.mubr.msk.bf16.vlgmr.msra.gmra.mrb[4].mxu1 %vm646_vm10, %v773_v32  ;;  %vm545_vm2 = vcmp.eq.s32.totalorder %v541_v42, %v900_v29 }
  0xbd   :  { %643 = vmatmul.mubr.msk.bf16.vlgmr.msra.gmra.mrb[4].mxu0 %vm642_vm11, %v773_v32  ;;  %433 = vmatpush1.bf16.msra.mxu1 %v822_v5 }
  0xbe   :  { %373 = vmatpush1.bf16.msra.mxu0 %v822_v5  ;;  %434 = vmatprep.subr.bf16.mxu1 %v824_v6 }
  0xbf   :  { %374 = vmatprep.subr.bf16.mxu0 %v824_v6  ;;  %404 = vmatprep.mubr.bf16.mxu0 %v766_v1  ;;  %v544_v43 = vpop.permute.xlu1 %543 }
  0xc0   :  { %464 = vmatprep.mubr.bf16.mxu1 %v766_v1  ;;  %vm546_vm3 = vcmp.eq.s32.totalorder %v544_v43, %v900_v29 }
  0xc1   :  { %435 = vmatpush1.bf16.msra.mxu1 %v830_v7  ;;  %vm662_vm6 = vmpackc.low %vm546_vm3, %vm545_vm2 }
  0xc2   :  { %375 = vmatpush1.bf16.msra.mxu0 %v830_v7  ;;  %436 = vmatprep.subr.bf16.mxu1 %v836_v8 }
  0xc3   :  { %376 = vmatprep.subr.bf16.mxu0 %v836_v8 }
  0xc5   :  { %437 = vmatpush1.bf16.msra.mxu1 %v840_v9 }
  0xc6   :  { %377 = vmatpush1.bf16.msra.mxu0 %v840_v9  ;;  %438 = vmatprep.subr.bf16.mxu1 %v842_v11 }
  0xc7   :  { %378 = vmatprep.subr.bf16.mxu0 %v842_v11 }
  0xc9   :  { %439 = vmatpush1.bf16.msra.mxu1 %v850_v12 }
  0xca   :  { %379 = vmatpush1.bf16.msra.mxu0 %v850_v12  ;;  %440 = vmatprep.subr.bf16.mxu1 %v854_v13 }
  0xcb   :  { %380 = vmatprep.subr.bf16.mxu0 %v854_v13 }
  0xcd   :  { %441 = vmatpush1.bf16.msra.mxu1 %v862_v15 }
  0xce   :  { %381 = vmatpush1.bf16.msra.mxu0 %v862_v15  ;;  %442 = vmatprep.subr.bf16.mxu1 %v864_v16 }
  0xcf   :  { %382 = vmatprep.subr.bf16.mxu0 %v864_v16 }
  0xd1   :  { %443 = vmatpush1.bf16.msra.mxu1 %v870_v19 }
  0xd2   :  { %383 = vmatpush1.bf16.msra.mxu0 %v870_v19  ;;  %444 = vmatprep.subr.bf16.mxu1 %v874_v20 }
  0xd3   :  { %384 = vmatprep.subr.bf16.mxu0 %v874_v20 }
  0xd5   :  { %445 = vmatpush1.bf16.msra.mxu1 %v879_v22 }
  0xd6   :  { %385 = vmatpush1.bf16.msra.mxu0 %v879_v22  ;;  %446 = vmatprep.subr.bf16.mxu1 %v883_v23 }
  0xd7   :  { %386 = vmatprep.subr.bf16.mxu0 %v883_v23 }
  0xd9   :  { %447 = vmatpush1.bf16.msra.mxu1 %v888_v24 }
  0xda   :  { %387 = vmatpush1.bf16.msra.mxu0 %v888_v24  ;;  %552 = vmatprep.subr.bf16.mxu1 %v820_v4 }
  0xdb   :  { %492 = vmatprep.subr.bf16.mxu0 %v820_v4 }
  0xdc   :  { %655 = vmatmul.mubr.msk.bf16.vlgmr.msra.gmra.mrb[8].mxu1 %vm654_vm0, %v773_v32 }
  0xdd   :  { %651 = vmatmul.mubr.msk.bf16.vlgmr.msra.gmra.mrb[8].mxu0 %vm650_vm1, %v773_v32  ;;  %553 = vmatpush1.bf16.msra.mxu1 %v822_v5 }
  0xde   :  { %493 = vmatpush1.bf16.msra.mxu0 %v822_v5  ;;  %554 = vmatprep.subr.bf16.mxu1 %v824_v6 }
  0xdf   :  { %494 = vmatprep.subr.bf16.mxu0 %v824_v6  ;;  %524 = vmatprep.mubr.bf16.mxu0 %v766_v1 }
  0xe0   :  { %584 = vmatprep.mubr.bf16.mxu1 %v766_v1 }
  0xe1   :  { %555 = vmatpush1.bf16.msra.mxu1 %v830_v7 }
  0xe2   :  { %495 = vmatpush1.bf16.msra.mxu0 %v830_v7  ;;  %556 = vmatprep.subr.bf16.mxu1 %v836_v8 }
  0xe3   :  { %496 = vmatprep.subr.bf16.mxu0 %v836_v8 }
  0xe5   :  { %557 = vmatpush1.bf16.msra.mxu1 %v840_v9 }
  0xe6   :  { %497 = vmatpush1.bf16.msra.mxu0 %v840_v9  ;;  %558 = vmatprep.subr.bf16.mxu1 %v842_v11 }
  0xe7   :  { %498 = vmatprep.subr.bf16.mxu0 %v842_v11 }
  0xe9   :  { %559 = vmatpush1.bf16.msra.mxu1 %v850_v12 }
  0xea   :  { %499 = vmatpush1.bf16.msra.mxu0 %v850_v12  ;;  %560 = vmatprep.subr.bf16.mxu1 %v854_v13 }
  0xeb   :  { %500 = vmatprep.subr.bf16.mxu0 %v854_v13 }
  0xed   :  { %561 = vmatpush1.bf16.msra.mxu1 %v862_v15 }
  0xee   :  { %501 = vmatpush1.bf16.msra.mxu0 %v862_v15  ;;  %562 = vmatprep.subr.bf16.mxu1 %v864_v16 }
  0xef   :  { %502 = vmatprep.subr.bf16.mxu0 %v864_v16 }
  0xf1   :  { %563 = vmatpush1.bf16.msra.mxu1 %v870_v19 }
  0xf2   :  { %503 = vmatpush1.bf16.msra.mxu0 %v870_v19  ;;  %564 = vmatprep.subr.bf16.mxu1 %v874_v20 }
  0xf3   :  { %504 = vmatprep.subr.bf16.mxu0 %v874_v20 }
  0xf5   :  { %565 = vmatpush1.bf16.msra.mxu1 %v879_v22 }
  0xf6   :  { %505 = vmatpush1.bf16.msra.mxu0 %v879_v22  ;;  %566 = vmatprep.subr.bf16.mxu1 %v883_v23 }
  0xf7   :  { %506 = vmatprep.subr.bf16.mxu0 %v883_v23 }
  0xf9   :  { %567 = vmatpush1.bf16.msra.mxu1 %v888_v24 }
  0xfa   :  { %507 = vmatpush1.bf16.msra.mxu0 %v888_v24 }
  0xfc   :  { %663 = vmatmul.mubr.msk.bf16.vlgmr.msra.gmra.mrb[12].mxu1 %vm662_vm6, %v773_v32 }
  0xfd   :  { %659 = vmatmul.mubr.msk.bf16.vlgmr.msra.gmra.mrb[12].mxu0 %vm658_vm7, %v773_v32 }
 0x16f   :  { %v228_v45 = vpop.f32.mrb[0].mxu1 }
 0x170   :  { %v174_v46 = vpop.f32.mrb[0].mxu0  ;;  %v230_v47 = vpop.f32.mrb[1].mxu1 }
 0x171   :  { %v176_v48 = vpop.f32.mrb[1].mxu0  ;;  %v237_v49 = vadd.f32 %v230_v47, %v174_v46  ;;  %v232_v50 = vpop.f32.mrb[2].mxu1 }
 0x172   :  { %v177_v51 = vpop.f32.mrb[2].mxu0  ;;  %v234_v52 = vpop.f32.mrb[3].mxu1 }
 0x173   :  { %v179_v53 = vpop.f32.mrb[3].mxu0  ;;  %v238_v54 = vadd.f32 %v234_v52, %v177_v51 }
 0x18f   :  { %v346_v55 = vpop.f32.mrb[4].mxu1 }
 0x190   :  { %v286_v56 = vpop.f32.mrb[4].mxu0  ;;  %v348_v57 = vpop.f32.mrb[5].mxu1 }
 0x191   :  { %v288_v58 = vpop.f32.mrb[5].mxu0  ;;  %v355_v59 = vadd.f32 %v348_v57, %v286_v56  ;;  %v350_v60 = vpop.f32.mrb[6].mxu1 }
 0x192   :  { %v295_v61 = vadd.f32 %v288_v58, %v228_v45  ;;  %v290_v62 = vpop.f32.mrb[6].mxu0  ;;  %v352_v63 = vpop.f32.mrb[7].mxu1 }
 0x193   :  { %v292_v0 = vpop.f32.mrb[7].mxu0  ;;  %v356_v1 = vadd.f32 %v352_v63, %v290_v62 }
 0x194   :  { %v297_v2 = vmax.f32 %v237_v49, %v295_v61  ;;  %v296_v3 = vadd.f32 %v292_v0, %v232_v50 }
 0x196   :  { %v357_v4 = vmax.f32 %v297_v2, %v355_v59  ;;  %v298_v5 = vmax.f32 %v238_v54, %v296_v3 }
 0x198   :  { %v358_v6 = vmax.f32 %v298_v5, %v356_v1 }
 0x1af   :  { %v466_v7 = vpop.f32.mrb[8].mxu1 }
 0x1b0   :  { %v406_v8 = vpop.f32.mrb[8].mxu0  ;;  %v468_v9 = vpop.f32.mrb[9].mxu1 }
 0x1b1   :  { %v408_v10 = vpop.f32.mrb[9].mxu0  ;;  %v475_v11 = vadd.f32 %v468_v9, %v406_v8  ;;  %v470_v12 = vpop.f32.mrb[10].mxu1 }
 0x1b2   :  { %v415_v13 = vadd.f32 %v408_v10, %v346_v55  ;;  %v410_v14 = vpop.f32.mrb[10].mxu0  ;;  %v472_v15 = vpop.f32.mrb[11].mxu1 }
 0x1b3   :  { %v412_v16 = vpop.f32.mrb[11].mxu0  ;;  %v476_v17 = vadd.f32 %v472_v15, %v410_v14 }
 0x1b4   :  { %v417_v18 = vmax.f32 %v357_v4, %v415_v13  ;;  %v416_v19 = vadd.f32 %v412_v16, %v350_v60 }
 0x1b6   :  { %v477_v20 = vmax.f32 %v417_v18, %v475_v11  ;;  %v418_v21 = vmax.f32 %v358_v6, %v416_v19 }
 0x1b8   :  { %v478_v22 = vmax.f32 %v418_v21, %v476_v17 }
 0x1cf   :  { %v586_v23 = vpop.f32.mrb[12].mxu1 }
 0x1d0   :  { %v526_v24 = vpop.f32.mrb[12].mxu0  ;;  %v587_v25 = vpop.f32.mrb[13].mxu1 }
 0x1d1   :  { %v528_v26 = vpop.f32.mrb[13].mxu0  ;;  %v593_v27 = vadd.f32 %v587_v25, %v526_v24  ;;  %v589_v28 = vpop.f32.mrb[14].mxu1 }
 0x1d2   :  { %v535_v29 = vadd.f32 %v528_v26, %v466_v7  ;;  %v530_v30 = vpop.f32.mrb[14].mxu0  ;;  %v590_v31 = vpop.f32.mrb[15].mxu1 }
 0x1d3   :  { %v532_v32 = vpop.f32.mrb[15].mxu0  ;;  %v594_v33 = vadd.f32 %v590_v31, %v530_v30 }
 0x1d4   :  { %v537_v34 = vmax.f32 %v477_v20, %v535_v29  ;;  %v536_v35 = vadd.f32 %v532_v32, %v470_v12 }
 0x1d6   :  { %v595_v36 = vmax.f32 %v537_v34, %v593_v27  ;;  %v538_v37 = vmax.f32 %v478_v22, %v536_v35 }
 0x1d8   :  { %597 = vst [vmem:[#allocation5] sm:$0xff] %v595_v36  ;;  %v596_v38 = vmax.f32 %v538_v37, %v594_v33 }
 0x1da   :  { %598 = vst [vmem:[#allocation5 + $0x8] sm:$0xff] %v596_v38 }
 0x1db   :  { %747 = shalt.err (!%p744_p12)
}
 0x1dc   :  { %s748_s30 = scalar_lea.hbm %s1043_s2, 256 }
 0x1dd   :  { %p749_p13 = scmp.ne.s32.totalorder %s1043_s2, %s748_s30  ;;  %p752_p0 = scmp.lt.u32.totalorder %s748_s30, %s1043_s2 }
 0x1df   :  { %p754_p1 = pnand %p752_p0, %p749_p13 }
 0x1e1   :  { %757 = shalt.err (!%p754_p1)
}
 0x1e2   :  { %610 = dma.vmem_to_hbm [thread:$0]  %s605_s1, 256, %s1043_s2, [#allocation4], %s763_s19, %s763_s19, %s764_s20  }
 0x1e3   :  { %760 = dma.done.wait [#allocation4], 256  }
 0x1e4   :  { %761 = vsyncadd [#allocation4], 4294967040 }
 0x1e5   :  { %614 = vsyncpa [#allocation3], 1 }
 0x1e6   :  { %615 = vsyncpa [#allocation4], 1 }

</bundles_post_ra>
